<compile_context>
chip_gen: v7x
topology: tpu7x:2x2x1
jax: 0.10.0
libtpu: 0.0.40
codegen_flags: <defaults>
</compile_context>

<pallas_src>
import math
import jax
import jax.numpy as jnp
from jax.experimental import pallas as pl
from jax.experimental.pallas import tpu as pltpu


# ---------------------------------------------------------------------------
# Kernels
# ---------------------------------------------------------------------------
def ffn_kernel_resident(x_ref, w1_ref, b1_ref, w2_ref, b2_ref, o_ref):
    """W1/W2 fully VMEM-resident; 1-D grid over row tiles."""
    h = jnp.dot(x_ref[...], w1_ref[...], preferred_element_type=jnp.float32)
    h = jnp.maximum(h + b1_ref[...].astype(jnp.float32), 0.0)
    # eval-mode dropout == identity
    acc = jnp.dot(h.astype(w2_ref.dtype), w2_ref[...],
                  preferred_element_type=jnp.float32)
    o_ref[...] = (acc + b2_ref[...].astype(jnp.float32)).astype(o_ref.dtype)


def ffn_kernel_streamed(x_ref, w1_ref, b1_ref, w2_ref, b2_ref, o_ref, acc_ref):
    """d_ff streamed in chunks along the k grid axis; f32 accumulator in VMEM."""
    k = pl.program_id(1)

    @pl.when(k == 0)
    def _init():
        acc_ref[...] = jnp.zeros_like(acc_ref)

    h = jnp.dot(x_ref[...], w1_ref[...], preferred_element_type=jnp.float32)
    h = jnp.maximum(h + b1_ref[...].astype(jnp.float32), 0.0)
    # eval-mode dropout == identity
    acc_ref[...] += jnp.dot(h.astype(w2_ref.dtype), w2_ref[...],
                            preferred_element_type=jnp.float32)

    @pl.when(k == pl.num_programs(1) - 1)
    def _finalize():
        o_ref[...] = (acc_ref[...] + b2_ref[...].astype(jnp.float32)).astype(o_ref.dtype)


# ---------------------------------------------------------------------------
# Tiling helpers
# ---------------------------------------------------------------------------
def _round_up(x, m):
    return ((x + m - 1) // m) * m


def _vmem_budget_bytes():
    """~85% of physical VMEM (headroom for Mosaic internal scratch)."""
    try:
        cap = int(pltpu.get_tpu_info().vmem_capacity_bytes)
        if cap <= 0:
            raise ValueError
    except Exception:
        cap = 64 << 20  # conservative (v7x-sized) fallback
    return int(0.85 * cap)


def _choose_row_tile(M, d_model, isz, budget, preferred):
    """Row tile tm (MXU-aligned, multiple of 128) and padded row count."""
    if M <= 256:
        return M, M  # full-dim block: always layout-legal, no padding needed
    tm = max(128, (min(preferred, 1024) // 128) * 128)
    # x + out tiles (double-buffered) + f32 acc must leave >= half the budget for weights.
    while tm > 128 and (2 * isz * tm * d_model * 2 + 4 * tm * d_model) > budget // 2:
        tm = max(128, _round_up(tm // 2, 128))
    m_pad = _round_up(M, tm)
    # Keep >= 2 row tiles so the "parallel" M axis can feed both v7x TensorCores.
    while m_pad // tm < 2 and tm > 128:
        tm = max(128, _round_up(tm // 2, 128))
        m_pad = _round_up(M, tm)
    return tm, m_pad


def _pick_divisor_tile(total, preferred, aligns=(256, 128)):
    """Largest tile <= preferred dividing `total`, aligned to 256 (else 128), else total."""
    if total <= preferred:
        return total
    for align in aligns:
        t = (preferred // align) * align
        while t >= align:
            if total % t == 0:
                return t
            t -= align
    return total


# ---------------------------------------------------------------------------
# Wrapper
# ---------------------------------------------------------------------------
def feed_forward(x, w1, b1, w2, b2, *, tile_m=None, tile_k=None,
                 compute_dtype=None, weights_resident=None):
    """FFN forward: relu(x @ w1 + b1) @ w2 + b2 (eval-mode dropout == identity).

    x: [B, S, d_model]; w1: [d_model, d_ff]; b1: [d_ff]; w2: [d_ff, d_model]; b2: [d_model]
    compute_dtype: optionally cast x/W1/W2 (e.g. jnp.bfloat16); accumulation stays f32,
                   output keeps x.dtype.
    weights_resident: True/False to force a path; None = auto from the VMEM budget.
    """
    B, S, d_model = x.shape
    d_ff = w1.shape[1]
    M = B * S
    out_dtype = x.dtype

    cdtype = jnp.dtype(compute_dtype) if compute_dtype is not None else jnp.dtype(x.dtype)
    isz = cdtype.itemsize
    bsz = jnp.dtype(b1.dtype).itemsize

    budget = _vmem_budget_bytes()

    # Row tile is the arithmetic-intensity knob: bigger VMEM (v5e/v6e) -> taller tiles.
    preferred_tm = tile_m if tile_m is not None else (1024 if budget > (80 << 20) else 512)
    tm, m_pad = _choose_row_tile(M, d_model, isz, budget, preferred_tm)

    x2d = x.reshape(M, d_model).astype(cdtype)
    if m_pad != M:
        x2d = jnp.pad(x2d, ((0, m_pad - M), (0, 0)))
    w1c = w1.astype(cdtype)
    w2c = w2.astype(cdtype)
    b1_2d = b1.reshape(1, d_ff)
    b2_2d = b2.reshape(1, d_model)

    act_bytes = 2 * isz * tm * d_model * 2                                   # x + out tiles, 2-buffered
    weight_bytes = 2 * (isz * 2 * d_model * d_ff + bsz * (d_ff + d_model))   # conservative 2-buffered

    resident = (act_bytes + weight_bytes <= budget) if weights_resident is None else weights_resident
    grid_m = m_pad // tm

    if resident:
        vmem_est = act_bytes + weight_bytes
        grid_spec = pltpu.PrefetchScalarGridSpec(
            num_scalar_prefetch=0,
            grid=(grid_m,),
            in_specs=[
                pl.BlockSpec((tm, d_model), lambda i: (i, 0)),      # x row tile
                pl.BlockSpec((d_model, d_ff), lambda i: (0, 0)),    # W1 resident
                pl.BlockSpec((1, d_ff), lambda i: (0, 0)),          # b1 resident
                pl.BlockSpec((d_ff, d_model), lambda i: (0, 0)),    # W2 resident
                pl.BlockSpec((1, d_model), lambda i: (0, 0)),       # b2 resident
            ],
            out_specs=pl.BlockSpec((tm, d_model), lambda i: (i, 0)),
        )
        kernel = ffn_kernel_resident
        semantics = ("parallel",)
    else:
        preferred_tk = tile_k if tile_k is not None else (2048 if budget > (80 << 20) else 1024)
        fixed = act_bytes + 4 * tm * d_model + 2 * bsz * d_model
        per_tk = 2 * (isz * 2 * d_model + bsz)          # W1+W2 chunk columns + b1, double-buffered
        max_tk = max(128, (budget - fixed) // max(per_tk, 1))
        tk = _pick_divisor_tile(d_ff, min(preferred_tk, max_tk))
        vmem_est = fixed + per_tk * tk
        grid_spec = pltpu.PrefetchScalarGridSpec(
            num_scalar_prefetch=0,
            grid=(grid_m, d_ff // tk),
            in_specs=[
                pl.BlockSpec((tm, d_model), lambda i, k: (i, 0)),   # x tile (reused across k)
                pl.BlockSpec((d_model, tk), lambda i, k: (0, k)),   # W1 chunk
                pl.BlockSpec((1, tk), lambda i, k: (0, k)),         # b1 chunk
                pl.BlockSpec((tk, d_model), lambda i, k: (k, 0)),   # W2 chunk
                pl.BlockSpec((1, d_model), lambda i, k: (0, 0)),    # b2
            ],
            out_specs=pl.BlockSpec((tm, d_model), lambda i, k: (i, 0)),
            scratch_shapes=[pltpu.VMEM((tm, d_model), jnp.float32)],
        )
        # TODO(synk): on v5e, add pipeline_mode=pl.Buffered(3) to the W1/W2 specs if a
        #             profile shows exposed weight-chunk DMA.
        kernel = ffn_kernel_streamed
        semantics = ("parallel", "arbitrary")

    vmem_limit = int(min(budget, max(int(1.3 * vmem_est), 32 << 20)))

    out2d = pl.pallas_call(
        kernel,
        out_shape=jax.ShapeDtypeStruct((m_pad, d_model), out_dtype),
        grid_spec=grid_spec,
        compiler_params=pltpu.CompilerParams(
            dimension_semantics=semantics,
            vmem_limit_bytes=vmem_limit,
        ),
    )(x2d, w1c, b1_2d, w2c, b2_2d)

    if m_pad != M:
        out2d = out2d[:M]
    return out2d.reshape(B, S, d_model)


# ---------------------------------------------------------------------------
# Params / reference / test
# ---------------------------------------------------------------------------
def init_params(key, d_model, d_ff, dtype=jnp.float32):
    """Deterministic init mimicking torch.nn.Linear defaults (uniform +-1/sqrt(fan_in))."""
    k1, k2, k3, k4 = jax.random.split(key, 4)
    lim1 = 1.0 / math.sqrt(d_model)
    lim2 = 1.0 / math.sqrt(d_ff)
    # Stored pre-transposed: w1 is [d_model, d_ff] (== PyTorch W1.T)
    w1 = jax.random.uniform(k1, (d_model, d_ff), dtype, -lim1, lim1)
    b1 = jax.random.uniform(k2, (d_ff,), dtype, -lim1, lim1)
    w2 = jax.random.uniform(k3, (d_ff, d_model), dtype, -lim2, lim2)
    b2 = jax.random.uniform(k4, (d_model,), dtype, -lim2, lim2)
    return w1, b1, w2, b2


def _reference(x, w1, b1, w2, b2):
    hp = jax.lax.Precision.HIGHEST
    h = jnp.maximum(jnp.dot(x, w1, precision=hp) + b1, 0.0)
    return jnp.dot(h, w2, precision=hp) + b2


if __name__ == "__main__":
    key = jax.random.PRNGKey(0)

    # --- Test 1: small shape, f32, auto (resident) path, strict tolerance.
    batch, seq, d_model, d_ff = 2, 8, 32, 64
    kx, kp, key = jax.random.split(key, 3)
    x = jax.random.normal(kx, (batch, seq, d_model), jnp.float32)
    w1, b1, w2, b2 = init_params(kp, d_model, d_ff)

    out = jax.block_until_ready(feed_forward(x, w1, b1, w2, b2))
    ref = _reference(x, w1, b1, w2, b2)
    assert out.shape == (batch, seq, d_model)
    assert jnp.allclose(out, ref, atol=1e-5, rtol=1e-5)

    # --- Test 2: M not a multiple of the row tile (padding + 2 row tiles),
    #             bf16 compute with f32 accumulation, loose tolerance.
    batch, seq, d_model, d_ff = 2, 200, 128, 512
    kx, kp, key = jax.random.split(key, 3)
    x = jax.random.normal(kx, (batch, seq, d_model), jnp.float32)
    w1, b1, w2, b2 = init_params(kp, d_model, d_ff)

    out_bf16 = jax.block_until_ready(
        feed_forward(x, w1, b1, w2, b2, compute_dtype=jnp.bfloat16))
    ref = _reference(x, w1, b1, w2, b2)
    assert out_bf16.shape == (batch, seq, d_model)
    assert out_bf16.dtype == x.dtype
    assert jnp.allclose(out_bf16, ref, atol=5e-2, rtol=5e-2)

    # --- Test 3: same problem, f32, forced streamed-K path (accumulator + pl.when).
    out_stream = jax.block_until_ready(
        feed_forward(x, w1, b1, w2, b2, weights_resident=False, tile_k=256))
    assert jnp.allclose(out_stream, ref, atol=1e-4, rtol=1e-4)

    print("KERNEL_OK")
</pallas_src>

<mosaic_0001>
module attributes {stable_mosaic.version = 11 : i64} {
  func.func @ffn_kernel_resident(%arg0: i32, %arg1: memref<16x32xf32, #tpu.memory_space<vmem>>, %arg2: memref<32x64xf32, #tpu.memory_space<vmem>>, %arg3: memref<1x64xf32, #tpu.memory_space<vmem>>, %arg4: memref<64x32xf32, #tpu.memory_space<vmem>>, %arg5: memref<1x32xf32, #tpu.memory_space<vmem>>, %arg6: memref<16x32xf32, #tpu.memory_space<vmem>>) attributes {dimension_semantics = [#tpu.dimension_semantics<parallel>], iteration_bounds = array<i64: 1>, scalar_prefetch = 0 : i64, scratch_operands = 0 : i64, tpu.core_type = #tpu.core_type<tc>, window_params = [{transform_indices = @transform_0, window_bounds = array<i64: 16, 32>}, {pipeline_mode = #tpu.pipeline_mode<synchronous>, transform_indices = @transform_1, window_bounds = array<i64: 32, 64>}, {pipeline_mode = #tpu.pipeline_mode<synchronous>, transform_indices = @transform_2, window_bounds = array<i64: 1, 64>}, {pipeline_mode = #tpu.pipeline_mode<synchronous>, transform_indices = @transform_3, window_bounds = array<i64: 64, 32>}, {pipeline_mode = #tpu.pipeline_mode<synchronous>, transform_indices = @transform_4, window_bounds = array<i64: 1, 32>}, {transform_indices = @transform_5, window_bounds = array<i64: 16, 32>}]} {
    %c0 = arith.constant 0 : index
    %c0_0 = arith.constant 0 : index
    %0 = vector.load %arg1[%c0, %c0_0] : memref<16x32xf32, #tpu.memory_space<vmem>>, vector<16x32xf32>
    %c0_1 = arith.constant 0 : index
    %c0_2 = arith.constant 0 : index
    %1 = vector.load %arg2[%c0_1, %c0_2] : memref<32x64xf32, #tpu.memory_space<vmem>>, vector<32x64xf32>
    %cst = arith.constant dense<0.000000e+00> : vector<16x64xf32>
    %2 = tpu.matmul %0, %1, %cst {dimension_numbers = #tpu.dot_dimension_numbers<[1], [0], [0], [1], [0, 0, 1, 1], [], []>} : vector<16x32xf32>, vector<32x64xf32>, vector<16x64xf32> -> vector<16x64xf32>
    %c0_3 = arith.constant 0 : index
    %c0_4 = arith.constant 0 : index
    %3 = vector.load %arg3[%c0_3, %c0_4] : memref<1x64xf32, #tpu.memory_space<vmem>>, vector<1x64xf32>
    %4 = vector.broadcast %3 : vector<1x64xf32> to vector<16x64xf32>
    %5 = arith.addf %2, %4 : vector<16x64xf32>
    %cst_5 = arith.constant 0.000000e+00 : f32
    %6 = vector.broadcast %cst_5 : f32 to vector<16x64xf32>
    %7 = arith.maximumf %5, %6 : vector<16x64xf32>
    %c0_6 = arith.constant 0 : index
    %c0_7 = arith.constant 0 : index
    %8 = vector.load %arg4[%c0_6, %c0_7] : memref<64x32xf32, #tpu.memory_space<vmem>>, vector<64x32xf32>
    %cst_8 = arith.constant dense<0.000000e+00> : vector<16x32xf32>
    %9 = tpu.matmul %7, %8, %cst_8 {dimension_numbers = #tpu.dot_dimension_numbers<[1], [0], [0], [1], [0, 0, 1, 1], [], []>} : vector<16x64xf32>, vector<64x32xf32>, vector<16x32xf32> -> vector<16x32xf32>
    %c0_9 = arith.constant 0 : index
    %c0_10 = arith.constant 0 : index
    %10 = vector.load %arg5[%c0_9, %c0_10] : memref<1x32xf32, #tpu.memory_space<vmem>>, vector<1x32xf32>
    %11 = vector.broadcast %10 : vector<1x32xf32> to vector<16x32xf32>
    %12 = arith.addf %9, %11 : vector<16x32xf32>
    %c0_11 = arith.constant 0 : index
    %c0_12 = arith.constant 0 : index
    %13 = vector.load %arg6[%c0_11, %c0_12] : memref<16x32xf32, #tpu.memory_space<vmem>>, vector<16x32xf32>
    tpu.vector_store %arg6[%c0_11, %c0_12], %12 {strides = array<i32>} : memref<16x32xf32, #tpu.memory_space<vmem>>, vector<16x32xf32>,
    return
  }
  func.func @transform_0(%arg0: i32) -> (i32, i32) {
    %c0_i32 = arith.constant 0 : i32
    %c0_i32_0 = arith.constant 0 : i32
    return %arg0, %c0_i32 : i32, i32
  }
  func.func @transform_1(%arg0: i32) -> (i32, i32) {
    %c0_i32 = arith.constant 0 : i32
    %c0_i32_0 = arith.constant 0 : i32
    %c0_i32_1 = arith.constant 0 : i32
    return %c0_i32, %c0_i32_0 : i32, i32
  }
  func.func @transform_2(%arg0: i32) -> (i32, i32) {
    %c0_i32 = arith.constant 0 : i32
    %c0_i32_0 = arith.constant 0 : i32
    %c0_i32_1 = arith.constant 0 : i32
    return %c0_i32, %c0_i32_0 : i32, i32
  }
  func.func @transform_3(%arg0: i32) -> (i32, i32) {
    %c0_i32 = arith.constant 0 : i32
    %c0_i32_0 = arith.constant 0 : i32
    %c0_i32_1 = arith.constant 0 : i32
    return %c0_i32, %c0_i32_0 : i32, i32
  }
  func.func @transform_4(%arg0: i32) -> (i32, i32) {
    %c0_i32 = arith.constant 0 : i32
    %c0_i32_0 = arith.constant 0 : i32
    %c0_i32_1 = arith.constant 0 : i32
    return %c0_i32, %c0_i32_0 : i32, i32
  }
  func.func @transform_5(%arg0: i32) -> (i32, i32) {
    %c0_i32 = arith.constant 0 : i32
    %c0_i32_0 = arith.constant 0 : i32
    return %arg0, %c0_i32 : i32, i32
  }
}

</mosaic_0001>

<bundles_post_ra>
// kernel: tpu_custom_call.1
= control target key start
LH: loop header
LB: loop body
LE: loop exit
PB: predicated region body
PF: predicated region fallthrough
CT: control target
= control target key end

     0   :  { %vm34_vm0 = vcmask 261120   ;;  %s433_s0 = inlined_call_operand.vmem [shape: f32[16,32], index: 0, kind: input, shape index: {}]   ;;  %s434_s1 = inlined_call_operand.vmem [shape: f32[32,64], index: 1, kind: input, shape index: {}]   ;;  %s435_s2 = inlined_call_operand.vmem [shape: f32[1,64], index: 2, kind: input, shape index: {}]   ;;  %s436_s3 = inlined_call_operand.vmem [shape: f32[64,32], index: 3, kind: input, shape index: {}]   ;;  %s437_s4 = inlined_call_operand.vmem [shape: f32[1,32], index: 4, kind: input, shape index: {}]   ;;  %s438_s5 = inlined_call_operand.hbm [shape: f32[16,32], index: 5, kind: output, shape index: {}]  }
   0x1   :  { %v23_v0 = vld [vmem:[%s434_s1] sm:$0xff]  ;;  %v24_v1 = vld [vmem:[%s434_s1 + $0x8] sm:$0xff]  ;;  %v25_v2 = vld [vmem:[%s434_s1 + $0x10] sm:$0xff] }
   0x2   :  { %v285_v3 = vpack.c.bf16 %v24_v1, %v23_v0  ;;  %v26_v4 = vld [vmem:[%s434_s1 + $0x18] sm:$0xff]  ;;  %v21_v5 = vld [vmem:[%s433_s0] sm:$0xff]  ;;  %v119_v8 = vld [vmem:[%s436_s3 + $0x8] sm:$0xff] }
   0x3   :  { %v289_v6 = vpack.c.bf16 %v26_v4, %v25_v2  ;;  %263 = vmatprep.mubr.msk.f32.mxu0 %vm34_vm0, %v21_v5  ;;  %v118_v7 = vld [vmem:[%s436_s3] sm:$0xff]  ;;  %v120_v9 = vld [vmem:[%s436_s3 + $0x10] sm:$0xff]  ;;  %v121_v11 = vld [vmem:[%s436_s3 + $0x18] sm:$0xff] }
   0x4   :  { %286 = vmatprep.subr.bf16.mxu0 %v285_v3  ;;  %v293_v10 = vpack.c.bf16 %v119_v8, %v118_v7  ;;  %v297_v12 = vpack.c.bf16 %v121_v11, %v120_v9  ;;  %v122_v13 = vld [vmem:[%s436_s3 + $0x20] sm:$0xff]  ;;  %v123_v14 = vld [vmem:[%s436_s3 + $0x28] sm:$0xff] }
   0x5   :  { %288 = vmatpush3.bf16.msra.mxu0 %v285_v3 }
   0x6   :  { %10 = vsyncpa [#allocation3], 0  ;;  %290 = vmatprep.subr.bf16.mxu0 %v289_v6  ;;  %294 = vmatprep.subr.bf16.mxu1 %v293_v10  ;;  %v301_v15 = vpack.c.bf16 %v123_v14, %v122_v13  ;;  %v22_v16 = vld [vmem:[%s433_s0 + $0x8] sm:$0xff]  ;;  %v124_v17 = vld [vmem:[%s436_s3 + $0x30] sm:$0xff]  ;;  %vm133_vm1 = vcmask 523264  }
   0x7   :  { %296 = vmatpush3.bf16.msra.mxu1 %v293_v10  ;;  %v125_v18 = vld [vmem:[%s436_s3 + $0x38] sm:$0xff]  ;;  %v233_v20 = vld [vmem:[%s435_s2] ss:$0 sm:$0xff]  ;;  %s336_s3 = smov [#allocation2]  }
   0x8   :  { %298 = vmatprep.subr.bf16.mxu1 %v297_v12  ;;  %v305_v19 = vpack.c.bf16 %v125_v18, %v124_v17  ;;  %v236_v27 = vld [vmem:[%s437_s4] ss:$0 sm:$0xff]  ;;  %s222_s23 = sshll.u32 %s336_s3, 4  ;;  %s223_s23 = int_to_ptr.vmem [resolvable:$true] %s222_s23 }
   0x9   :  { %292 = vmatpush3.bf16.msra.mxu0 %v289_v6  ;;  %s312_s2 = scalar_lea.vmem %s223_s23, 256  ;;  %p317_p1 = scmp.lt.s32.totalorder %s223_s23, %s223_s23 }
   0xa   :  { %p313_p0 = scmp.ne.s32.totalorder %s223_s23, %s312_s2  ;;  %p318_p2 = scmp.lt.s32.totalorder %s312_s2, %s312_s2 }
   0xb   :  { %300 = vmatpush3.bf16.msra.mxu1 %v297_v12 }
   0xc   :  { %264 = vmatmul.mubr.msk.f32.vlgmr.msra.gmra.mrb[0].mxu0 %vm34_vm0, %v22_v16  ;;  %302 = vmatprep.subr.bf16.mxu1 %v301_v15  ;;  %p319_p3 = por %p318_p2, %p317_p1 }
   0xe   :  { %p320_p4 = pnand %p319_p3, %p313_p0 }
   0xf   :  { %304 = vmatpush3.bf16.msra.mxu1 %v301_v15 }
  0x10   :  { %306 = vmatprep.subr.bf16.mxu1 %v305_v19 }
  0x13   :  { %308 = vmatpush3.bf16.msra.mxu1 %v305_v19 }
  0xdf   :  { %v265_v21 = vpop.f32.mrb[0].mxu0 }
  0xe0   :  { %v113_v22 = vadd.f32 %v265_v21, %v233_v20  ;;  %v107_v23 = vpop.f32.mrb[1].mxu0 }
  0xe1   :  { %v108_v24 = vadd.f32 %v233_v20, %v107_v23 }
  0xe2   :  { %v117_v26 = vmax.f32 %v113_v22, 0.0 }
  0xe3   :  { %v116_v25 = vmax.f32 %v108_v24, 0.0 }
  0xe5   :  { %282 = vmatprep.mubr.msk.f32.mxu1 %vm133_vm1, %v116_v25 }
  0xe6   :  { %283 = vmatmul.mubr.msk.f32.vlgmr.msra.gmra.mrb[0].mxu1 %vm133_vm1, %v117_v26 }
 0x1b9   :  { %v284_v28 = vpop.f32.mrb[0].mxu1 }
 0x1ba   :  { %v212_v29 = vadd.f32 %v284_v28, %v236_v27  ;;  %v206_v30 = vpop.f32.mrb[1].mxu1 }
 0x1bb   :  { %v207_v31 = vadd.f32 %v236_v27, %v206_v30 }
 0x1bc   :  { %216 = vst.msk [vmem:[#allocation2 + $0x8] sm:$0xff] %vm34_vm0, %v212_v29 }
 0x1bd   :  { %215 = vst.msk [vmem:[#allocation2] sm:$0xff] %vm34_vm0, %v207_v31 }
 0x1be   :  { %323 = shalt.err (!%p320_p4)
}
 0x1bf   :  { %s324_s25 = scalar_lea.hbm %s438_s5, 256 }
 0x1c0   :  { %p325_p5 = scmp.ne.s32.totalorder %s438_s5, %s324_s25  ;;  %p328_p6 = scmp.lt.u32.totalorder %s324_s25, %s438_s5 }
 0x1c2   :  { %p330_p7 = pnand %p328_p6, %p325_p5 }
 0x1c4   :  { %333 = shalt.err (!%p330_p7)
}
 0x1c5   :  { %s337_s30 = smov 128   ;;  %s338_s6 = smov 8  }
 0x1c6   :  { %228 = dma.vmem_to_hbm [thread:$0]  %s223_s23, 256, %s438_s5, [#allocation3], %s337_s30, %s337_s30, %s338_s6  }
 0x1c7   :  { %334 = dma.done.wait [#allocation3], 256  }
 0x1c8   :  { %335 = vsyncadd [#allocation3], 4294967040 }
 0x1c9   :  { %232 = vsyncpa [#allocation3], 1 }

</bundles_post_ra>
